<compile_context>
chip_gen: v6e
topology: v6e:2x2x1
jax: 0.10.0
libtpu: 0.0.40
codegen_flags: <defaults>
</compile_context>

<pallas_src>
import functools
import math

import jax
import jax.numpy as jnp
from jax.experimental import pallas as pl
from jax.experimental.pallas import tpu as pltpu


# ----------------------------------------------------------------------------
# Interpolation-matrix construction (host/XLA side, tiny)
# ----------------------------------------------------------------------------
def _interp_matrix(n_out: int, n_in: int, scale: float) -> jnp.ndarray:
    """1-D bilinear interpolation matrix, PyTorch align_corners=False semantics."""
    out_idx = jnp.arange(n_out, dtype=jnp.float32)
    # PyTorch: src = (dst + 0.5) / scale - 0.5, clamped below at 0
    src = (out_idx + 0.5) / scale - 0.5
    src = jnp.maximum(src, 0.0)
    i0 = jnp.floor(src).astype(jnp.int32)
    i0 = jnp.clip(i0, 0, n_in - 1)
    i1 = jnp.minimum(i0 + 1, n_in - 1)
    w1 = src - i0.astype(jnp.float32)
    w0 = 1.0 - w1
    m0 = jax.nn.one_hot(i0, n_in, dtype=jnp.float32) * w0[:, None]
    m1 = jax.nn.one_hot(i1, n_in, dtype=jnp.float32) * w1[:, None]
    return m0 + m1  # (n_out, n_in)


# ----------------------------------------------------------------------------
# Kernels
# ----------------------------------------------------------------------------
def _fused_kernel(x_ref, m_ref, o_ref):
    # x_ref: (S, D_in)   lane-dense (D_in % 128 == 0)
    # m_ref: (D_in, D_out)  pre-composed kron(Wh, Ww)^T
    # o_ref: (S, D_out)  lane-dense (D_out % 128 == 0) -> unmasked stores
    o_ref[...] = jnp.dot(
        x_ref[...], m_ref[...], preferred_element_type=jnp.float32
    ).astype(o_ref.dtype)


def _separable_kernel(x_ref, wh_ref, wwt_ref, o_ref):
    # x_ref  : (S, H_in, W_in)
    # wh_ref : (H_out, H_in)
    # wwt_ref: (W_in, W_out)   already transposed on the host
    # o_ref  : (S, H_out, W_out)
    wh = wh_ref[...]
    wwt = wwt_ref[...]
    for i in range(x_ref.shape[0]):  # S is small & static -> unrolled, dots overlap
        tmp = jnp.dot(x_ref[i], wwt, preferred_element_type=jnp.float32)  # (H_in, W_out)
        o_ref[i] = jnp.dot(wh, tmp, preferred_element_type=jnp.float32).astype(o_ref.dtype)


# ----------------------------------------------------------------------------
# Tiling choice helpers
# ----------------------------------------------------------------------------
_MAX_BLOCK_BYTES = 6 * 1024 * 1024     # in+out block bytes per grid step (pre double-buffer)
_VMEM_LIMIT_BYTES = 32 * 1024 * 1024   # safe on v5e/v6e (128 MiB) and v7x (64 MiB)
_MAX_KRON_BYTES = 8 * 1024 * 1024      # cap on the fused weight matrix


def _pick_slab_batch(nc, bytes_per_slab, max_block_bytes, max_s=None):
    """Largest divisor S of nc whose block fits the budget, preferring choices
    that leave >= 2 grid steps so both v7x TensorCores get work."""
    divisors = [d for d in range(1, nc + 1) if nc % d == 0]
    feasible = [
        d for d in divisors
        if d * bytes_per_slab <= max_block_bytes and (max_s is None or d <= max_s)
    ]
    if not feasible:
        return 1
    multi = [d for d in feasible if nc // d >= 2]
    return max(multi) if multi else max(feasible)


# ----------------------------------------------------------------------------
# Wrapper (= UpSample.forward for mode='bilinear', align_corners=False)
# ----------------------------------------------------------------------------
@functools.partial(jax.jit, static_argnames=("scale_factor",))
def upsample_bilinear(x: jnp.ndarray, scale_factor: float = 2.0) -> jnp.ndarray:
    """x: (N, C, H, W) float32 -> (N, C, floor(H*sf), floor(W*sf)), bilinear."""
    n, c, h_in, w_in = x.shape
    h_out = int(math.floor(h_in * scale_factor))
    w_out = int(math.floor(w_in * scale_factor))
    nc = n * c
    itemsize = jnp.dtype(x.dtype).itemsize

    wh = _interp_matrix(h_out, h_in, float(scale_factor))  # (H_out, H_in)
    ww = _interp_matrix(w_out, w_in, float(scale_factor))  # (W_out, W_in)

    d_in = h_in * w_in
    d_out = h_out * w_out
    bytes_per_slab = (d_in + d_out) * itemsize
    kron_bytes = d_in * d_out * 4

    use_fused = (
        kron_bytes <= _MAX_KRON_BYTES and d_in % 128 == 0 and d_out % 128 == 0
    )

    compiler_params = pltpu.CompilerParams(
        dimension_semantics=("parallel",),
        vmem_limit_bytes=_VMEM_LIMIT_BYTES,
    )

    if use_fused:
        s = _pick_slab_batch(nc, bytes_per_slab, _MAX_BLOCK_BYTES)
        g = nc // s
        # m[h*W_in + w, o*W_out + p] = Wh[o, h] * Ww[p, w]   (= kron(Wh, Ww)^T)
        m = jnp.einsum("oh,pw->hwop", wh, ww).reshape(d_in, d_out)
        x_blk = x.reshape(g, s, d_in)  # contiguous HBM reshape: free

        out = pl.pallas_call(
            _fused_kernel,
            out_shape=jax.ShapeDtypeStruct((g, s, d_out), x.dtype),
            grid_spec=pltpu.PrefetchScalarGridSpec(
                num_scalar_prefetch=0,
                grid=(g,),
                in_specs=[
                    pl.BlockSpec((None, s, d_in), lambda i: (i, 0, 0)),
                    pl.BlockSpec((d_in, d_out), lambda i: (0, 0)),
                ],
                out_specs=pl.BlockSpec((None, s, d_out), lambda i: (i, 0, 0)),
            ),
            compiler_params=compiler_params,
        )(x_blk, m)
        return out.reshape(n, c, h_out, w_out)

    # Fallback: separable two-matmul path (batched S slabs, Ww pre-transposed).
    s = _pick_slab_batch(nc, bytes_per_slab, _MAX_BLOCK_BYTES, max_s=16)
    g = nc // s
    wwt = ww.T  # (W_in, W_out) -- transpose hoisted out of the kernel
    x_blk = x.reshape(nc, h_in, w_in)

    out = pl.pallas_call(
        _separable_kernel,
        out_shape=jax.ShapeDtypeStruct((nc, h_out, w_out), x.dtype),
        grid_spec=pltpu.PrefetchScalarGridSpec(
            num_scalar_prefetch=0,
            grid=(g,),
            in_specs=[
                pl.BlockSpec((s, h_in, w_in), lambda i: (i, 0, 0)),
                pl.BlockSpec((h_out, h_in), lambda i: (0, 0)),
                pl.BlockSpec((w_in, w_out), lambda i: (0, 0)),
            ],
            out_specs=pl.BlockSpec((s, h_out, w_out), lambda i: (i, 0, 0)),
        ),
        compiler_params=compiler_params,
    )(x_blk, wh, wwt)
    return out.reshape(n, c, h_out, w_out)


# ----------------------------------------------------------------------------
# Self-test
# ----------------------------------------------------------------------------
if __name__ == "__main__":
    key = jax.random.PRNGKey(0)
    k1, k2 = jax.random.split(key)

    # Primary shape (fused lane-dense path): NCHW, scale_factor=2, bilinear.
    x = jax.random.normal(k1, (2, 4, 16, 16), dtype=jnp.float32)
    out = jax.block_until_ready(upsample_bilinear(x, scale_factor=2.0))
    wh = _interp_matrix(32, 16, 2.0)
    ww = _interp_matrix(32, 16, 2.0)
    ref = jnp.einsum("oh,nchw,pw->ncop", wh, x, ww)
    assert out.shape == (2, 4, 32, 32)
    assert float(jnp.max(jnp.abs(out - ref))) < 1e-5

    # Also exercise the separable fallback path (spatial dims not 128-aligned).
    x2 = jax.random.normal(k2, (1, 3, 24, 24), dtype=jnp.float32)
    out2 = jax.block_until_ready(upsample_bilinear(x2, scale_factor=2.0))
    wh2 = _interp_matrix(48, 24, 2.0)
    ww2 = _interp_matrix(48, 24, 2.0)
    ref2 = jnp.einsum("oh,nchw,pw->ncop", wh2, x2, ww2)
    assert out2.shape == (1, 3, 48, 48)
    assert float(jnp.max(jnp.abs(out2 - ref2))) < 1e-5

    print("KERNEL_OK")
</pallas_src>

<mosaic_0001>
module attributes {stable_mosaic.version = 11 : i64} {
  func.func @_fused_kernel(%arg0: i32, %arg1: memref<1x4x256xf32, #tpu.memory_space<vmem>>, %arg2: memref<256x1024xf32, #tpu.memory_space<vmem>>, %arg3: memref<1x4x1024xf32, #tpu.memory_space<vmem>>) attributes {dimension_semantics = [#tpu.dimension_semantics<parallel>], iteration_bounds = array<i64: 2>, scalar_prefetch = 0 : i64, scratch_operands = 0 : i64, tpu.core_type = #tpu.core_type<tc>, window_params = [{transform_indices = @transform_0, window_bounds = array<i64: 1, 4, 256>}, {pipeline_mode = #tpu.pipeline_mode<synchronous>, transform_indices = @transform_1, window_bounds = array<i64: 256, 1024>}, {transform_indices = @transform_2, window_bounds = array<i64: 1, 4, 1024>}]} {
    %c0 = arith.constant 0 : index
    %c0_0 = arith.constant 0 : index
    %c0_1 = arith.constant 0 : index
    %0 = vector.load %arg1[%c0, %c0_0, %c0_1] : memref<1x4x256xf32, #tpu.memory_space<vmem>>, vector<1x4x256xf32>
    %1 = vector.shape_cast %0 : vector<1x4x256xf32> to vector<4x256xf32>
    %c0_2 = arith.constant 0 : index
    %c0_3 = arith.constant 0 : index
    %2 = vector.load %arg2[%c0_2, %c0_3] : memref<256x1024xf32, #tpu.memory_space<vmem>>, vector<256x1024xf32>
    %cst = arith.constant dense<0.000000e+00> : vector<4x1024xf32>
    %3 = tpu.matmul %1, %2, %cst {dimension_numbers = #tpu.dot_dimension_numbers<[1], [0], [0], [1], [0, 0, 1, 1], [], []>} : vector<4x256xf32>, vector<256x1024xf32>, vector<4x1024xf32> -> vector<4x1024xf32>
    %c0_4 = arith.constant 0 : index
    %c0_5 = arith.constant 0 : index
    %c0_6 = arith.constant 0 : index
    %4 = vector.load %arg3[%c0_4, %c0_5, %c0_6] : memref<1x4x1024xf32, #tpu.memory_space<vmem>>, vector<1x4x1024xf32>
    %5 = vector.shape_cast %4 : vector<1x4x1024xf32> to vector<4x1024xf32>
    %6 = vector.shape_cast %3 : vector<4x1024xf32> to vector<1x4x1024xf32>
    tpu.vector_store %arg3[%c0_4, %c0_5, %c0_6], %6 {strides = array<i32>} : memref<1x4x1024xf32, #tpu.memory_space<vmem>>, vector<1x4x1024xf32>,
    return
  }
  func.func @transform_0(%arg0: i32) -> (i32, i32, i32) {
    %c0_i32 = arith.constant 0 : i32
    %c0_i32_0 = arith.constant 0 : i32
    %c0_i32_1 = arith.constant 0 : i32
    return %arg0, %c0_i32, %c0_i32_0 : i32, i32, i32
  }
  func.func @transform_1(%arg0: i32) -> (i32, i32) {
    %c0_i32 = arith.constant 0 : i32
    %c0_i32_0 = arith.constant 0 : i32
    %c0_i32_1 = arith.constant 0 : i32
    return %c0_i32, %c0_i32_0 : i32, i32
  }
  func.func @transform_2(%arg0: i32) -> (i32, i32, i32) {
    %c0_i32 = arith.constant 0 : i32
    %c0_i32_0 = arith.constant 0 : i32
    %c0_i32_1 = arith.constant 0 : i32
    return %arg0, %c0_i32, %c0_i32_0 : i32, i32, i32
  }
}

</mosaic_0001>

<bundles_post_ra>
// kernel: upsample_bilinear.1
= control target key start
LH: loop header
LB: loop body
LE: loop exit
PB: predicated region body
PF: predicated region fallthrough
CT: control target
= control target key end

     0   :  { %s808_s9 = smov 0   ;;  %s1621_s0 = inlined_call_operand.vmem [shape: f32[2,4,256], index: 0, kind: input, shape index: {}]   ;;  %s1622_s1 = inlined_call_operand.vmem [shape: f32[256,1024], index: 1, kind: input, shape index: {}]   ;;  %s1623_s2 = inlined_call_operand.vmem [shape: f32[2,4,1024], index: 2, kind: output, shape index: {}]  }
   0x1 LB: > { %s763_s10 = sadd.s32 4294967295, %s791_s9   ;;  %p767_p0 = scmp.ge.s32.totalorder %s791_s9, 1  ;;  %s791_s9 = sphi %s808_s9, %s12_s9  }
   0x2   : > { %p112_p1 = scmp.lt.s32.totalorder %s791_s9, 3 }
   0x4   : > { %p113_p2 = pnand %p767_p0, %p112_p1 }
   0x5   : > { %p1094_p3 = scmp.lt.s32.totalorder (!%p113_p2), %s763_s10, 1 }
   0x6   : > { %116 = sbr.rel (%p113_p2) target bundleno = 341 (0x155), region = 28 }
   0xb   : > { %v266_v0 = vld [vmem:[%s1622_s1 + $0x3c8] sm:$0xff]  ;;  %v268_v1 = vld [vmem:[%s1622_s1 + $0x3d8] sm:$0xff]  ;;  %v265_v2 = vld [vmem:[%s1622_s1 + $0x3c0] sm:$0xff]  ;;  %s1626_s10 = smov (!%p1094_p3, %s763_s10), 1 }
   0xc   : > { %404 = vmatprep.subr.mxu0 %v266_v0  ;;  %475 = vmatprep.subr.mxu1 %v268_v1  ;;  %v267_v3 = vld [vmem:[%s1622_s1 + $0x3d0] sm:$0xff]  ;;  %v258_v4 = vld [vmem:[%s1622_s1 + $0x388] sm:$0xff]  ;;  %v260_v5 = vld [vmem:[%s1622_s1 + $0x398] sm:$0xff]  ;;  %s774_s20 = sshll.u32 %s1626_s10, 3  ;;  %s775_s6 = sshll.u32 %s1626_s10, 5 }
   0xd   : > { %405 = vmatpush1.msra.mxu0 %v265_v2  ;;  %476 = vmatpush1.msra.mxu1 %v267_v3  ;;  %v257_v6 = vld [vmem:[%s1622_s1 + $0x380] sm:$0xff]  ;;  %v259_v7 = vld [vmem:[%s1622_s1 + $0x390] sm:$0xff]  ;;  %v250_v8 = vld [vmem:[%s1622_s1 + $0x348] sm:$0xff]  ;;  %s138_s7 = scalar_lea.vmem %s1621_s0, %s774_s20  ;;  %s143_s11 = scalar_lea.vmem %s1623_s2, %s775_s6 }
   0xe   : > { %406 = vmatprep.subr.mxu0 %v258_v4  ;;  %477 = vmatprep.subr.mxu1 %v260_v5  ;;  %v252_v9 = vld [vmem:[%s1622_s1 + $0x358] sm:$0xff]  ;;  %v249_v10 = vld [vmem:[%s1622_s1 + $0x340] sm:$0xff]  ;;  %v251_v11 = vld [vmem:[%s1622_s1 + $0x350] sm:$0xff] }
   0xf   : > { %407 = vmatpush1.msra.mxu0 %v257_v6  ;;  %478 = vmatpush1.msra.mxu1 %v259_v7  ;;  %v242_v12 = vld [vmem:[%s1622_s1 + $0x308] sm:$0xff]  ;;  %v244_v13 = vld [vmem:[%s1622_s1 + $0x318] sm:$0xff]  ;;  %v241_v14 = vld [vmem:[%s1622_s1 + $0x300] sm:$0xff] }
  0x10   : > { %408 = vmatprep.subr.mxu0 %v250_v8  ;;  %479 = vmatprep.subr.mxu1 %v252_v9  ;;  %v243_v15 = vld [vmem:[%s1622_s1 + $0x310] sm:$0xff]  ;;  %v234_v16 = vld [vmem:[%s1622_s1 + $0x2c8] sm:$0xff]  ;;  %v236_v17 = vld [vmem:[%s1622_s1 + $0x2d8] sm:$0xff] }
  0x11   : > { %409 = vmatpush1.msra.mxu0 %v249_v10  ;;  %480 = vmatpush1.msra.mxu1 %v251_v11  ;;  %v233_v18 = vld [vmem:[%s1622_s1 + $0x2c0] sm:$0xff]  ;;  %v235_v19 = vld [vmem:[%s1622_s1 + $0x2d0] sm:$0xff]  ;;  %v226_v20 = vld [vmem:[%s1622_s1 + $0x288] sm:$0xff] }
  0x12   : > { %410 = vmatprep.subr.mxu0 %v242_v12  ;;  %481 = vmatprep.subr.mxu1 %v244_v13  ;;  %v228_v21 = vld [vmem:[%s1622_s1 + $0x298] sm:$0xff]  ;;  %v225_v22 = vld [vmem:[%s1622_s1 + $0x280] sm:$0xff]  ;;  %v227_v23 = vld [vmem:[%s1622_s1 + $0x290] sm:$0xff] }
  0x13   : > { %411 = vmatpush1.msra.mxu0 %v241_v14  ;;  %482 = vmatpush1.msra.mxu1 %v243_v15  ;;  %v218_v24 = vld [vmem:[%s1622_s1 + $0x248] sm:$0xff]  ;;  %v220_v25 = vld [vmem:[%s1622_s1 + $0x258] sm:$0xff]  ;;  %v217_v26 = vld [vmem:[%s1622_s1 + $0x240] sm:$0xff] }
  0x14   : > { %412 = vmatprep.subr.mxu0 %v234_v16  ;;  %483 = vmatprep.subr.mxu1 %v236_v17  ;;  %v219_v27 = vld [vmem:[%s1622_s1 + $0x250] sm:$0xff]  ;;  %v210_v28 = vld [vmem:[%s1622_s1 + $0x208] sm:$0xff]  ;;  %v212_v29 = vld [vmem:[%s1622_s1 + $0x218] sm:$0xff] }
  0x15   : > { %413 = vmatpush1.msra.mxu0 %v233_v18  ;;  %484 = vmatpush1.msra.mxu1 %v235_v19  ;;  %v209_v30 = vld [vmem:[%s1622_s1 + $0x200] sm:$0xff]  ;;  %v211_v31 = vld [vmem:[%s1622_s1 + $0x210] sm:$0xff]  ;;  %v202_v32 = vld [vmem:[%s1622_s1 + $0x1c8] sm:$0xff] }
  0x16   : > { %414 = vmatprep.subr.mxu0 %v226_v20  ;;  %485 = vmatprep.subr.mxu1 %v228_v21  ;;  %v204_v33 = vld [vmem:[%s1622_s1 + $0x1d8] sm:$0xff]  ;;  %v201_v34 = vld [vmem:[%s1622_s1 + $0x1c0] sm:$0xff]  ;;  %v203_v35 = vld [vmem:[%s1622_s1 + $0x1d0] sm:$0xff] }
  0x17   : > { %415 = vmatpush1.msra.mxu0 %v225_v22  ;;  %486 = vmatpush1.msra.mxu1 %v227_v23  ;;  %v194_v36 = vld [vmem:[%s1622_s1 + $0x188] sm:$0xff]  ;;  %v196_v37 = vld [vmem:[%s1622_s1 + $0x198] sm:$0xff]  ;;  %v193_v38 = vld [vmem:[%s1622_s1 + $0x180] sm:$0xff] }
  0x18   : > { %416 = vmatprep.subr.mxu0 %v218_v24  ;;  %487 = vmatprep.subr.mxu1 %v220_v25  ;;  %v195_v39 = vld [vmem:[%s1622_s1 + $0x190] sm:$0xff]  ;;  %v186_v40 = vld [vmem:[%s1622_s1 + $0x148] sm:$0xff]  ;;  %v188_v41 = vld [vmem:[%s1622_s1 + $0x158] sm:$0xff] }
  0x19   : > { %417 = vmatpush1.msra.mxu0 %v217_v26  ;;  %488 = vmatpush1.msra.mxu1 %v219_v27  ;;  %v185_v42 = vld [vmem:[%s1622_s1 + $0x140] sm:$0xff]  ;;  %v187_v43 = vld [vmem:[%s1622_s1 + $0x150] sm:$0xff]  ;;  %v178_v44 = vld [vmem:[%s1622_s1 + $0x108] sm:$0xff] }
  0x1a   : > { %418 = vmatprep.subr.mxu0 %v210_v28  ;;  %489 = vmatprep.subr.mxu1 %v212_v29  ;;  %v180_v45 = vld [vmem:[%s1622_s1 + $0x118] sm:$0xff]  ;;  %v177_v46 = vld [vmem:[%s1622_s1 + $0x100] sm:$0xff]  ;;  %v179_v47 = vld [vmem:[%s1622_s1 + $0x110] sm:$0xff] }
  0x1b   : > { %419 = vmatpush1.msra.mxu0 %v209_v30  ;;  %490 = vmatpush1.msra.mxu1 %v211_v31  ;;  %v170_v48 = vld [vmem:[%s1622_s1 + $0xc8] sm:$0xff]  ;;  %v172_v49 = vld [vmem:[%s1622_s1 + $0xd8] sm:$0xff]  ;;  %v169_v50 = vld [vmem:[%s1622_s1 + $0xc0] sm:$0xff] }
  0x1c   : > { %420 = vmatprep.subr.mxu0 %v202_v32  ;;  %491 = vmatprep.subr.mxu1 %v204_v33  ;;  %v171_v51 = vld [vmem:[%s1622_s1 + $0xd0] sm:$0xff]  ;;  %v162_v52 = vld [vmem:[%s1622_s1 + $0x88] sm:$0xff]  ;;  %v164_v53 = vld [vmem:[%s1622_s1 + $0x98] sm:$0xff] }
  0x1d   : > { %421 = vmatpush1.msra.mxu0 %v201_v34  ;;  %492 = vmatpush1.msra.mxu1 %v203_v35  ;;  %v161_v54 = vld [vmem:[%s1622_s1 + $0x80] sm:$0xff]  ;;  %v163_v55 = vld [vmem:[%s1622_s1 + $0x90] sm:$0xff]  ;;  %v154_v56 = vld [vmem:[%s1622_s1 + $0x48] sm:$0xff] }
  0x1e   : > { %422 = vmatprep.subr.mxu0 %v194_v36  ;;  %493 = vmatprep.subr.mxu1 %v196_v37  ;;  %v156_v57 = vld [vmem:[%s1622_s1 + $0x58] sm:$0xff]  ;;  %v153_v58 = vld [vmem:[%s1622_s1 + $0x40] sm:$0xff]  ;;  %v155_v59 = vld [vmem:[%s1622_s1 + $0x50] sm:$0xff] }
  0x1f   : > { %423 = vmatpush1.msra.mxu0 %v193_v38  ;;  %494 = vmatpush1.msra.mxu1 %v195_v39  ;;  %v146_v60 = vld [vmem:[%s1622_s1 + $0x8] sm:$0xff]  ;;  %v148_v61 = vld [vmem:[%s1622_s1 + $0x18] sm:$0xff]  ;;  %v145_v62 = vld [vmem:[%s1622_s1] sm:$0xff] }
  0x20   : > { %424 = vmatprep.subr.mxu0 %v186_v40  ;;  %495 = vmatprep.subr.mxu1 %v188_v41  ;;  %v147_v63 = vld [vmem:[%s1622_s1 + $0x10] sm:$0xff]  ;;  %v394_v0 = vld [vmem:[%s1622_s1 + $0x7c8] sm:$0xff]  ;;  %v396_v1 = vld [vmem:[%s1622_s1 + $0x7d8] sm:$0xff] }
  0x21   : > { %425 = vmatpush1.msra.mxu0 %v185_v42  ;;  %496 = vmatpush1.msra.mxu1 %v187_v43  ;;  %v393_v2 = vld [vmem:[%s1622_s1 + $0x7c0] sm:$0xff]  ;;  %v395_v3 = vld [vmem:[%s1622_s1 + $0x7d0] sm:$0xff]  ;;  %v386_v4 = vld [vmem:[%s1622_s1 + $0x788] sm:$0xff] }
  0x22   : > { %426 = vmatprep.subr.mxu0 %v178_v44  ;;  %497 = vmatprep.subr.mxu1 %v180_v45  ;;  %v388_v5 = vld [vmem:[%s1622_s1 + $0x798] sm:$0xff]  ;;  %v385_v6 = vld [vmem:[%s1622_s1 + $0x780] sm:$0xff]  ;;  %v387_v7 = vld [vmem:[%s1622_s1 + $0x790] sm:$0xff] }
  0x23   : > { %427 = vmatpush1.msra.mxu0 %v177_v46  ;;  %498 = vmatpush1.msra.mxu1 %v179_v47  ;;  %v378_v8 = vld [vmem:[%s1622_s1 + $0x748] sm:$0xff]  ;;  %v380_v9 = vld [vmem:[%s1622_s1 + $0x758] sm:$0xff]  ;;  %v377_v10 = vld [vmem:[%s1622_s1 + $0x740] sm:$0xff] }
  0x24   : > { %428 = vmatprep.subr.mxu0 %v170_v48  ;;  %499 = vmatprep.subr.mxu1 %v172_v49  ;;  %v379_v11 = vld [vmem:[%s1622_s1 + $0x750] sm:$0xff]  ;;  %v370_v12 = vld [vmem:[%s1622_s1 + $0x708] sm:$0xff]  ;;  %v372_v13 = vld [vmem:[%s1622_s1 + $0x718] sm:$0xff] }
  0x25   : > { %429 = vmatpush1.msra.mxu0 %v169_v50  ;;  %500 = vmatpush1.msra.mxu1 %v171_v51  ;;  %v369_v14 = vld [vmem:[%s1622_s1 + $0x700] sm:$0xff]  ;;  %v371_v15 = vld [vmem:[%s1622_s1 + $0x710] sm:$0xff]  ;;  %v362_v16 = vld [vmem:[%s1622_s1 + $0x6c8] sm:$0xff] }
  0x26   : > { %430 = vmatprep.subr.mxu0 %v162_v52  ;;  %501 = vmatprep.subr.mxu1 %v164_v53  ;;  %v364_v17 = vld [vmem:[%s1622_s1 + $0x6d8] sm:$0xff]  ;;  %v361_v18 = vld [vmem:[%s1622_s1 + $0x6c0] sm:$0xff]  ;;  %v363_v19 = vld [vmem:[%s1622_s1 + $0x6d0] sm:$0xff] }
  0x27   : > { %431 = vmatpush1.msra.mxu0 %v161_v54  ;;  %502 = vmatpush1.msra.mxu1 %v163_v55  ;;  %v354_v20 = vld [vmem:[%s1622_s1 + $0x688] sm:$0xff]  ;;  %v356_v21 = vld [vmem:[%s1622_s1 + $0x698] sm:$0xff]  ;;  %v353_v22 = vld [vmem:[%s1622_s1 + $0x680] sm:$0xff] }
  0x28   : > { %432 = vmatprep.subr.mxu0 %v154_v56  ;;  %503 = vmatprep.subr.mxu1 %v156_v57  ;;  %v355_v23 = vld [vmem:[%s1622_s1 + $0x690] sm:$0xff]  ;;  %v346_v24 = vld [vmem:[%s1622_s1 + $0x648] sm:$0xff]  ;;  %v348_v25 = vld [vmem:[%s1622_s1 + $0x658] sm:$0xff] }
  0x29   : > { %433 = vmatpush1.msra.mxu0 %v153_v58  ;;  %504 = vmatpush1.msra.mxu1 %v155_v59  ;;  %v345_v26 = vld [vmem:[%s1622_s1 + $0x640] sm:$0xff]  ;;  %v347_v27 = vld [vmem:[%s1622_s1 + $0x650] sm:$0xff]  ;;  %v338_v28 = vld [vmem:[%s1622_s1 + $0x608] sm:$0xff] }
  0x2a   : > { %434 = vmatprep.subr.mxu0 %v146_v60  ;;  %505 = vmatprep.subr.mxu1 %v148_v61  ;;  %v340_v29 = vld [vmem:[%s1622_s1 + $0x618] sm:$0xff]  ;;  %v337_v30 = vld [vmem:[%s1622_s1 + $0x600] sm:$0xff]  ;;  %v339_v31 = vld [vmem:[%s1622_s1 + $0x610] sm:$0xff] }
  0x2b   : > { %435 = vmatpush1.msra.mxu0 %v145_v62  ;;  %506 = vmatpush1.msra.mxu1 %v147_v63  ;;  %v330_v32 = vld [vmem:[%s1622_s1 + $0x5c8] sm:$0xff]  ;;  %v332_v33 = vld [vmem:[%s1622_s1 + $0x5d8] sm:$0xff]  ;;  %v329_v34 = vld [vmem:[%s1622_s1 + $0x5c0] sm:$0xff] }
  0x2c   : > { %436 = vmatprep.subr.mxu0 %v394_v0  ;;  %507 = vmatprep.subr.mxu1 %v396_v1  ;;  %v331_v35 = vld [vmem:[%s1622_s1 + $0x5d0] sm:$0xff]  ;;  %v322_v36 = vld [vmem:[%s1622_s1 + $0x588] sm:$0xff]  ;;  %v324_v37 = vld [vmem:[%s1622_s1 + $0x598] sm:$0xff] }
  0x2d   : > { %437 = vmatpush2.msra.mxu0 %v393_v2  ;;  %508 = vmatpush2.msra.mxu1 %v395_v3  ;;  %v321_v38 = vld [vmem:[%s1622_s1 + $0x580] sm:$0xff]  ;;  %v323_v39 = vld [vmem:[%s1622_s1 + $0x590] sm:$0xff]  ;;  %v314_v40 = vld [vmem:[%s1622_s1 + $0x548] sm:$0xff] }
  0x2e   : > { %438 = vmatprep.subr.mxu0 %v386_v4  ;;  %509 = vmatprep.subr.mxu1 %v388_v5  ;;  %v316_v41 = vld [vmem:[%s1622_s1 + $0x558] sm:$0xff]  ;;  %v313_v42 = vld [vmem:[%s1622_s1 + $0x540] sm:$0xff]  ;;  %v315_v43 = vld [vmem:[%s1622_s1 + $0x550] sm:$0xff] }
  0x2f   : > { %439 = vmatpush2.msra.mxu0 %v385_v6  ;;  %510 = vmatpush2.msra.mxu1 %v387_v7  ;;  %v306_v44 = vld [vmem:[%s1622_s1 + $0x508] sm:$0xff]  ;;  %v308_v45 = vld [vmem:[%s1622_s1 + $0x518] sm:$0xff]  ;;  %v305_v46 = vld [vmem:[%s1622_s1 + $0x500] sm:$0xff] }
  0x30   : > { %440 = vmatprep.subr.mxu0 %v378_v8  ;;  %511 = vmatprep.subr.mxu1 %v380_v9  ;;  %v307_v47 = vld [vmem:[%s1622_s1 + $0x510] sm:$0xff]  ;;  %v298_v48 = vld [vmem:[%s1622_s1 + $0x4c8] sm:$0xff]  ;;  %v300_v49 = vld [vmem:[%s1622_s1 + $0x4d8] sm:$0xff] }
  0x31   : > { %441 = vmatpush2.msra.mxu0 %v377_v10  ;;  %512 = vmatpush2.msra.mxu1 %v379_v11  ;;  %v297_v50 = vld [vmem:[%s1622_s1 + $0x4c0] sm:$0xff]  ;;  %v299_v51 = vld [vmem:[%s1622_s1 + $0x4d0] sm:$0xff]  ;;  %v290_v52 = vld [vmem:[%s1622_s1 + $0x488] sm:$0xff] }
  0x32   : > { %442 = vmatprep.subr.mxu0 %v370_v12  ;;  %513 = vmatprep.subr.mxu1 %v372_v13  ;;  %v292_v53 = vld [vmem:[%s1622_s1 + $0x498] sm:$0xff]  ;;  %v289_v54 = vld [vmem:[%s1622_s1 + $0x480] sm:$0xff]  ;;  %v291_v55 = vld [vmem:[%s1622_s1 + $0x490] sm:$0xff] }
  0x33   : > { %443 = vmatpush2.msra.mxu0 %v369_v14  ;;  %514 = vmatpush2.msra.mxu1 %v371_v15  ;;  %v1192_v56 = vld [vmem:[%s138_s7] sm:$0xff]  ;;  %v282_v57 = vld [vmem:[%s1622_s1 + $0x448] sm:$0xff]  ;;  %v284_v58 = vld [vmem:[%s1622_s1 + $0x458] sm:$0xff] }
  0x34   : > { %444 = vmatprep.subr.mxu0 %v362_v16  ;;  %515 = vmatprep.subr.mxu1 %v364_v17  ;;  %v281_v59 = vld [vmem:[%s1622_s1 + $0x440] sm:$0xff]  ;;  %v283_v60 = vld [vmem:[%s1622_s1 + $0x450] sm:$0xff]  ;;  %v274_v61 = vld [vmem:[%s1622_s1 + $0x408] sm:$0xff]  ;;  %v1214_v63 = vcombine.high %v1192_v56, %v1192_v56 }
  0x35   : > { %445 = vmatpush2.msra.mxu0 %v361_v18  ;;  %516 = vmatpush2.msra.mxu1 %v363_v19  ;;  %v276_v62 = vld [vmem:[%s1622_s1 + $0x418] sm:$0xff]  ;;  %v273_v0 = vld [vmem:[%s1622_s1 + $0x400] sm:$0xff]  ;;  %v275_v1 = vld [vmem:[%s1622_s1 + $0x410] sm:$0xff] }
  0x36   : > { %446 = vmatprep.subr.mxu0 %v354_v20  ;;  %517 = vmatprep.subr.mxu1 %v356_v21  ;;  %v270_v2 = vld [vmem:[%s1622_s1 + $0x3e8] sm:$0xff]  ;;  %v272_v3 = vld [vmem:[%s1622_s1 + $0x3f8] sm:$0xff]  ;;  %v269_v4 = vld [vmem:[%s1622_s1 + $0x3e0] sm:$0xff] }
  0x37   : > { %447 = vmatpush2.msra.mxu0 %v353_v22  ;;  %518 = vmatpush2.msra.mxu1 %v355_v23  ;;  %v271_v5 = vld [vmem:[%s1622_s1 + $0x3f0] sm:$0xff]  ;;  %v262_v6 = vld [vmem:[%s1622_s1 + $0x3a8] sm:$0xff]  ;;  %v264_v7 = vld [vmem:[%s1622_s1 + $0x3b8] sm:$0xff] }
  0x38   : > { %448 = vmatprep.subr.mxu0 %v346_v24  ;;  %519 = vmatprep.subr.mxu1 %v348_v25  ;;  %v261_v8 = vld [vmem:[%s1622_s1 + $0x3a0] sm:$0xff]  ;;  %v263_v9 = vld [vmem:[%s1622_s1 + $0x3b0] sm:$0xff]  ;;  %v254_v10 = vld [vmem:[%s1622_s1 + $0x368] sm:$0xff] }
  0x39   : > { %449 = vmatpush2.msra.mxu0 %v345_v26  ;;  %520 = vmatpush2.msra.mxu1 %v347_v27  ;;  %v256_v11 = vld [vmem:[%s1622_s1 + $0x378] sm:$0xff]  ;;  %v253_v12 = vld [vmem:[%s1622_s1 + $0x360] sm:$0xff]  ;;  %v255_v13 = vld [vmem:[%s1622_s1 + $0x370] sm:$0xff] }
  0x3a   : > { %450 = vmatprep.subr.mxu0 %v338_v28  ;;  %521 = vmatprep.subr.mxu1 %v340_v29  ;;  %v246_v14 = vld [vmem:[%s1622_s1 + $0x328] sm:$0xff]  ;;  %v248_v15 = vld [vmem:[%s1622_s1 + $0x338] sm:$0xff]  ;;  %v245_v16 = vld [vmem:[%s1622_s1 + $0x320] sm:$0xff] }
  0x3b   : > { %451 = vmatpush2.msra.mxu0 %v337_v30  ;;  %522 = vmatpush2.msra.mxu1 %v339_v31  ;;  %v247_v17 = vld [vmem:[%s1622_s1 + $0x330] sm:$0xff]  ;;  %v238_v18 = vld [vmem:[%s1622_s1 + $0x2e8] sm:$0xff]  ;;  %v240_v19 = vld [vmem:[%s1622_s1 + $0x2f8] sm:$0xff] }
  0x3c   : > { %452 = vmatprep.subr.mxu0 %v330_v32  ;;  %523 = vmatprep.subr.mxu1 %v332_v33  ;;  %v237_v20 = vld [vmem:[%s1622_s1 + $0x2e0] sm:$0xff]  ;;  %v239_v21 = vld [vmem:[%s1622_s1 + $0x2f0] sm:$0xff]  ;;  %v230_v22 = vld [vmem:[%s1622_s1 + $0x2a8] sm:$0xff] }
  0x3d   : > { %453 = vmatpush2.msra.mxu0 %v329_v34  ;;  %524 = vmatpush2.msra.mxu1 %v331_v35  ;;  %v232_v23 = vld [vmem:[%s1622_s1 + $0x2b8] sm:$0xff]  ;;  %v229_v24 = vld [vmem:[%s1622_s1 + $0x2a0] sm:$0xff]  ;;  %v231_v25 = vld [vmem:[%s1622_s1 + $0x2b0] sm:$0xff] }
  0x3e   : > { %454 = vmatprep.subr.mxu0 %v322_v36  ;;  %525 = vmatprep.subr.mxu1 %v324_v37  ;;  %v222_v26 = vld [vmem:[%s1622_s1 + $0x268] sm:$0xff]  ;;  %v224_v27 = vld [vmem:[%s1622_s1 + $0x278] sm:$0xff]  ;;  %v221_v28 = vld [vmem:[%s1622_s1 + $0x260] sm:$0xff] }
  0x3f   : > { %455 = vmatpush2.msra.mxu0 %v321_v38  ;;  %526 = vmatpush2.msra.mxu1 %v323_v39  ;;  %v223_v29 = vld [vmem:[%s1622_s1 + $0x270] sm:$0xff]  ;;  %v214_v30 = vld [vmem:[%s1622_s1 + $0x228] sm:$0xff]  ;;  %v216_v31 = vld [vmem:[%s1622_s1 + $0x238] sm:$0xff] }
  0x40   : > { %456 = vmatprep.subr.mxu0 %v314_v40  ;;  %527 = vmatprep.subr.mxu1 %v316_v41  ;;  %v213_v32 = vld [vmem:[%s1622_s1 + $0x220] sm:$0xff]  ;;  %v215_v33 = vld [vmem:[%s1622_s1 + $0x230] sm:$0xff]  ;;  %v206_v34 = vld [vmem:[%s1622_s1 + $0x1e8] sm:$0xff] }
  0x41   : > { %457 = vmatpush2.msra.mxu0 %v313_v42  ;;  %528 = vmatpush2.msra.mxu1 %v315_v43  ;;  %v208_v35 = vld [vmem:[%s1622_s1 + $0x1f8] sm:$0xff]  ;;  %v205_v36 = vld [vmem:[%s1622_s1 + $0x1e0] sm:$0xff]  ;;  %v207_v37 = vld [vmem:[%s1622_s1 + $0x1f0] sm:$0xff] }
  0x42   : > { %458 = vmatprep.subr.mxu0 %v306_v44  ;;  %529 = vmatprep.subr.mxu1 %v308_v45  ;;  %v198_v38 = vld [vmem:[%s1622_s1 + $0x1a8] sm:$0xff]  ;;  %v200_v39 = vld [vmem:[%s1622_s1 + $0x1b8] sm:$0xff]  ;;  %v197_v40 = vld [vmem:[%s1622_s1 + $0x1a0] sm:$0xff] }
  0x43   : > { %459 = vmatpush2.msra.mxu0 %v305_v46  ;;  %530 = vmatpush2.msra.mxu1 %v307_v47  ;;  %v199_v41 = vld [vmem:[%s1622_s1 + $0x1b0] sm:$0xff]  ;;  %v190_v42 = vld [vmem:[%s1622_s1 + $0x168] sm:$0xff]  ;;  %v192_v43 = vld [vmem:[%s1622_s1 + $0x178] sm:$0xff] }
  0x44   : > { %460 = vmatprep.subr.mxu0 %v298_v48  ;;  %531 = vmatprep.subr.mxu1 %v300_v49  ;;  %v189_v44 = vld [vmem:[%s1622_s1 + $0x160] sm:$0xff]  ;;  %v191_v45 = vld [vmem:[%s1622_s1 + $0x170] sm:$0xff]  ;;  %v182_v46 = vld [vmem:[%s1622_s1 + $0x128] sm:$0xff] }
  0x45   : > { %461 = vmatpush2.msra.mxu0 %v297_v50  ;;  %532 = vmatpush2.msra.mxu1 %v299_v51  ;;  %v184_v47 = vld [vmem:[%s1622_s1 + $0x138] sm:$0xff]  ;;  %v181_v48 = vld [vmem:[%s1622_s1 + $0x120] sm:$0xff]  ;;  %v183_v49 = vld [vmem:[%s1622_s1 + $0x130] sm:$0xff] }
  0x46   : > { %462 = vmatprep.subr.mxu0 %v290_v52  ;;  %533 = vmatprep.subr.mxu1 %v292_v53  ;;  %v174_v50 = vld [vmem:[%s1622_s1 + $0xe8] sm:$0xff]  ;;  %v176_v51 = vld [vmem:[%s1622_s1 + $0xf8] sm:$0xff]  ;;  %v173_v52 = vld [vmem:[%s1622_s1 + $0xe0] sm:$0xff] }
  0x47   : > { %463 = vmatpush2.msra.mxu0 %v289_v54  ;;  %534 = vmatpush2.msra.mxu1 %v291_v55  ;;  %v175_v53 = vld [vmem:[%s1622_s1 + $0xf0] sm:$0xff]  ;;  %v166_v54 = vld [vmem:[%s1622_s1 + $0xa8] sm:$0xff]  ;;  %v168_v55 = vld [vmem:[%s1622_s1 + $0xb8] sm:$0xff] }
  0x48   : > { %464 = vmatprep.subr.mxu0 %v282_v57  ;;  %535 = vmatprep.subr.mxu1 %v284_v58  ;;  %v165_v57 = vld [vmem:[%s1622_s1 + $0xa0] sm:$0xff]  ;;  %v167_v58 = vld [vmem:[%s1622_s1 + $0xb0] sm:$0xff] }
  0x49   : > { %465 = vmatpush2.msra.mxu0 %v281_v59  ;;  %536 = vmatpush2.msra.mxu1 %v283_v60  ;;  %v158_v59 = vld [vmem:[%s1622_s1 + $0x68] sm:$0xff]  ;;  %v160_v60 = vld [vmem:[%s1622_s1 + $0x78] sm:$0xff] }
  0x4a   : > { %466 = vmatprep.subr.mxu0 %v274_v61  ;;  %537 = vmatprep.subr.mxu1 %v276_v62  ;;  %v157_v61 = vld [vmem:[%s1622_s1 + $0x60] sm:$0xff]  ;;  %v159_v62 = vld [vmem:[%s1622_s1 + $0x70] sm:$0xff] }
  0x4b   : > { %467 = vmatpush2.msra.mxu0 %v273_v0  ;;  %468 = vmatprep.mubr.f32.mxu0 %v1214_v63  ;;  %v150_v0 = vld [vmem:[%s1622_s1 + $0x28] sm:$0xff] }
  0x4c   : > { %538 = vmatpush2.msra.mxu1 %v275_v1  ;;  %539 = vmatprep.mubr.f32.mxu1 %v1214_v63  ;;  %v152_v1 = vld [vmem:[%s1622_s1 + $0x38] sm:$0xff] }
  0x4d   : > { %469 = vmatmul.mubr.f32.vlgmr.msra.gmra.mxu0 %v1192_v56  ;;  %540 = vmatmul.mubr.f32.vlgmr.msra.gmra.mxu1 %v1192_v56 }
  0x4e   : > { %546 = vmatprep.subr.mxu0 %v270_v2  ;;  %617 = vmatprep.subr.mxu1 %v272_v3  ;;  %v149_v2 = vld [vmem:[%s1622_s1 + $0x20] sm:$0xff]  ;;  %v151_v3 = vld [vmem:[%s1622_s1 + $0x30] sm:$0xff] }
  0x4f   : > { %547 = vmatpush1.msra.mxu0 %v269_v4  ;;  %618 = vmatpush1.msra.mxu1 %v271_v5  ;;  %v398_v4 = vld [vmem:[%s1622_s1 + $0x7e8] sm:$0xff]  ;;  %v400_v5 = vld [vmem:[%s1622_s1 + $0x7f8] sm:$0xff] }
  0x50   : > { %548 = vmatprep.subr.mxu0 %v262_v6  ;;  %619 = vmatprep.subr.mxu1 %v264_v7  ;;  %v397_v6 = vld [vmem:[%s1622_s1 + $0x7e0] sm:$0xff]  ;;  %v399_v7 = vld [vmem:[%s1622_s1 + $0x7f0] sm:$0xff] }
  0x51   : > { %549 = vmatpush1.msra.mxu0 %v261_v8  ;;  %620 = vmatpush1.msra.mxu1 %v263_v9  ;;  %v390_v8 = vld [vmem:[%s1622_s1 + $0x7a8] sm:$0xff]  ;;  %v392_v9 = vld [vmem:[%s1622_s1 + $0x7b8] sm:$0xff] }
  0x52   : > { %550 = vmatprep.subr.mxu0 %v254_v10  ;;  %621 = vmatprep.subr.mxu1 %v256_v11  ;;  %v389_v10 = vld [vmem:[%s1622_s1 + $0x7a0] sm:$0xff]  ;;  %v391_v11 = vld [vmem:[%s1622_s1 + $0x7b0] sm:$0xff] }
  0x53   : > { %551 = vmatpush1.msra.mxu0 %v253_v12  ;;  %622 = vmatpush1.msra.mxu1 %v255_v13  ;;  %v382_v12 = vld [vmem:[%s1622_s1 + $0x768] sm:$0xff]  ;;  %v384_v13 = vld [vmem:[%s1622_s1 + $0x778] sm:$0xff] }
  0x54   : > { %552 = vmatprep.subr.mxu0 %v246_v14  ;;  %623 = vmatprep.subr.mxu1 %v248_v15  ;;  %v381_v14 = vld [vmem:[%s1622_s1 + $0x760] sm:$0xff]  ;;  %v383_v15 = vld [vmem:[%s1622_s1 + $0x770] sm:$0xff] }
  0x55   : > { %553 = vmatpush1.msra.mxu0 %v245_v16  ;;  %624 = vmatpush1.msra.mxu1 %v247_v17  ;;  %v374_v16 = vld [vmem:[%s1622_s1 + $0x728] sm:$0xff]  ;;  %v376_v17 = vld [vmem:[%s1622_s1 + $0x738] sm:$0xff] }
  0x56   : > { %554 = vmatprep.subr.mxu0 %v238_v18  ;;  %625 = vmatprep.subr.mxu1 %v240_v19  ;;  %v373_v18 = vld [vmem:[%s1622_s1 + $0x720] sm:$0xff]  ;;  %v375_v19 = vld [vmem:[%s1622_s1 + $0x730] sm:$0xff] }
  0x57   : > { %555 = vmatpush1.msra.mxu0 %v237_v20  ;;  %626 = vmatpush1.msra.mxu1 %v239_v21  ;;  %v366_v20 = vld [vmem:[%s1622_s1 + $0x6e8] sm:$0xff]  ;;  %v368_v21 = vld [vmem:[%s1622_s1 + $0x6f8] sm:$0xff] }
  0x58   : > { %556 = vmatprep.subr.mxu0 %v230_v22  ;;  %627 = vmatprep.subr.mxu1 %v232_v23  ;;  %v365_v22 = vld [vmem:[%s1622_s1 + $0x6e0] sm:$0xff]  ;;  %v367_v23 = vld [vmem:[%s1622_s1 + $0x6f0] sm:$0xff] }
  0x59   : > { %557 = vmatpush1.msra.mxu0 %v229_v24  ;;  %628 = vmatpush1.msra.mxu1 %v231_v25  ;;  %v358_v24 = vld [vmem:[%s1622_s1 + $0x6a8] sm:$0xff]  ;;  %v360_v25 = vld [vmem:[%s1622_s1 + $0x6b8] sm:$0xff] }
  0x5a   : > { %558 = vmatprep.subr.mxu0 %v222_v26  ;;  %629 = vmatprep.subr.mxu1 %v224_v27  ;;  %v357_v26 = vld [vmem:[%s1622_s1 + $0x6a0] sm:$0xff]  ;;  %v359_v27 = vld [vmem:[%s1622_s1 + $0x6b0] sm:$0xff] }
  0x5b   : > { %559 = vmatpush1.msra.mxu0 %v221_v28  ;;  %630 = vmatpush1.msra.mxu1 %v223_v29  ;;  %v350_v28 = vld [vmem:[%s1622_s1 + $0x668] sm:$0xff]  ;;  %v352_v29 = vld [vmem:[%s1622_s1 + $0x678] sm:$0xff] }
  0x5c   : > { %560 = vmatprep.subr.mxu0 %v214_v30  ;;  %631 = vmatprep.subr.mxu1 %v216_v31  ;;  %v349_v30 = vld [vmem:[%s1622_s1 + $0x660] sm:$0xff]  ;;  %v351_v31 = vld [vmem:[%s1622_s1 + $0x670] sm:$0xff] }
  0x5d   : > { %561 = vmatpush1.msra.mxu0 %v213_v32  ;;  %632 = vmatpush1.msra.mxu1 %v215_v33  ;;  %v342_v32 = vld [vmem:[%s1622_s1 + $0x628] sm:$0xff]  ;;  %v344_v33 = vld [vmem:[%s1622_s1 + $0x638] sm:$0xff] }
  0x5e   : > { %562 = vmatprep.subr.mxu0 %v206_v34  ;;  %633 = vmatprep.subr.mxu1 %v208_v35  ;;  %v341_v34 = vld [vmem:[%s1622_s1 + $0x620] sm:$0xff]  ;;  %v343_v35 = vld [vmem:[%s1622_s1 + $0x630] sm:$0xff] }
  0x5f   : > { %563 = vmatpush1.msra.mxu0 %v205_v36  ;;  %634 = vmatpush1.msra.mxu1 %v207_v37  ;;  %v334_v36 = vld [vmem:[%s1622_s1 + $0x5e8] sm:$0xff]  ;;  %v336_v37 = vld [vmem:[%s1622_s1 + $0x5f8] sm:$0xff] }
  0x60   : > { %564 = vmatprep.subr.mxu0 %v198_v38  ;;  %635 = vmatprep.subr.mxu1 %v200_v39  ;;  %v333_v38 = vld [vmem:[%s1622_s1 + $0x5e0] sm:$0xff]  ;;  %v335_v39 = vld [vmem:[%s1622_s1 + $0x5f0] sm:$0xff] }
  0x61   : > { %565 = vmatpush1.msra.mxu0 %v197_v40  ;;  %636 = vmatpush1.msra.mxu1 %v199_v41  ;;  %v326_v40 = vld [vmem:[%s1622_s1 + $0x5a8] sm:$0xff]  ;;  %v328_v41 = vld [vmem:[%s1622_s1 + $0x5b8] sm:$0xff] }
  0x62   : > { %566 = vmatprep.subr.mxu0 %v190_v42  ;;  %637 = vmatprep.subr.mxu1 %v192_v43  ;;  %v325_v42 = vld [vmem:[%s1622_s1 + $0x5a0] sm:$0xff]  ;;  %v327_v43 = vld [vmem:[%s1622_s1 + $0x5b0] sm:$0xff] }
  0x63   : > { %567 = vmatpush1.msra.mxu0 %v189_v44  ;;  %638 = vmatpush1.msra.mxu1 %v191_v45  ;;  %v318_v44 = vld [vmem:[%s1622_s1 + $0x568] sm:$0xff]  ;;  %v320_v45 = vld [vmem:[%s1622_s1 + $0x578] sm:$0xff] }
  0x64   : > { %568 = vmatprep.subr.mxu0 %v182_v46  ;;  %639 = vmatprep.subr.mxu1 %v184_v47  ;;  %v317_v46 = vld [vmem:[%s1622_s1 + $0x560] sm:$0xff]  ;;  %v319_v47 = vld [vmem:[%s1622_s1 + $0x570] sm:$0xff] }
  0x65   : > { %569 = vmatpush1.msra.mxu0 %v181_v48  ;;  %640 = vmatpush1.msra.mxu1 %v183_v49  ;;  %v310_v48 = vld [vmem:[%s1622_s1 + $0x528] sm:$0xff]  ;;  %v312_v49 = vld [vmem:[%s1622_s1 + $0x538] sm:$0xff] }
  0x66   : > { %570 = vmatprep.subr.mxu0 %v174_v50  ;;  %641 = vmatprep.subr.mxu1 %v176_v51  ;;  %v309_v50 = vld [vmem:[%s1622_s1 + $0x520] sm:$0xff]  ;;  %v311_v51 = vld [vmem:[%s1622_s1 + $0x530] sm:$0xff] }
  0x67   : > { %571 = vmatpush1.msra.mxu0 %v173_v52  ;;  %642 = vmatpush1.msra.mxu1 %v175_v53  ;;  %v302_v52 = vld [vmem:[%s1622_s1 + $0x4e8] sm:$0xff]  ;;  %v304_v53 = vld [vmem:[%s1622_s1 + $0x4f8] sm:$0xff] }
  0x68   : > { %572 = vmatprep.subr.mxu0 %v166_v54  ;;  %643 = vmatprep.subr.mxu1 %v168_v55  ;;  %v301_v54 = vld [vmem:[%s1622_s1 + $0x4e0] sm:$0xff]  ;;  %v303_v55 = vld [vmem:[%s1622_s1 + $0x4f0] sm:$0xff] }
  0x69   : > { %573 = vmatpush1.msra.mxu0 %v165_v57  ;;  %644 = vmatpush1.msra.mxu1 %v167_v58  ;;  %v294_v57 = vld [vmem:[%s1622_s1 + $0x4a8] sm:$0xff]  ;;  %v296_v58 = vld [vmem:[%s1622_s1 + $0x4b8] sm:$0xff] }
  0x6a   : > { %574 = vmatprep.subr.mxu0 %v158_v59  ;;  %645 = vmatprep.subr.mxu1 %v160_v60  ;;  %v293_v59 = vld [vmem:[%s1622_s1 + $0x4a0] sm:$0xff]  ;;  %v295_v60 = vld [vmem:[%s1622_s1 + $0x4b0] sm:$0xff] }
  0x6b   : > { %575 = vmatpush1.msra.mxu0 %v157_v61  ;;  %646 = vmatpush1.msra.mxu1 %v159_v62  ;;  %v286_v61 = vld [vmem:[%s1622_s1 + $0x468] sm:$0xff]  ;;  %v288_v62 = vld [vmem:[%s1622_s1 + $0x478] sm:$0xff] }
  0x6c   : > { %576 = vmatprep.subr.mxu0 %v150_v0  ;;  %647 = vmatprep.subr.mxu1 %v152_v1  ;;  %v285_v0 = vld [vmem:[%s1622_s1 + $0x460] sm:$0xff]  ;;  %v287_v1 = vld [vmem:[%s1622_s1 + $0x470] sm:$0xff] }
  0x6d   : > { %577 = vmatpush1.msra.mxu0 %v149_v2  ;;  %648 = vmatpush1.msra.mxu1 %v151_v3  ;;  %v278_v2 = vld [vmem:[%s1622_s1 + $0x428] sm:$0xff]  ;;  %v280_v3 = vld [vmem:[%s1622_s1 + $0x438] sm:$0xff] }
  0x6e   : > { %578 = vmatprep.subr.mxu0 %v398_v4  ;;  %649 = vmatprep.subr.mxu1 %v400_v5  ;;  %v277_v4 = vld [vmem:[%s1622_s1 + $0x420] sm:$0xff]  ;;  %v279_v5 = vld [vmem:[%s1622_s1 + $0x430] sm:$0xff] }
  0x6f   : > { %579 = vmatpush2.msra.mxu0 %v397_v6  ;;  %650 = vmatpush2.msra.mxu1 %v399_v7 }
  0x70   : > { %580 = vmatprep.subr.mxu0 %v390_v8  ;;  %651 = vmatprep.subr.mxu1 %v392_v9 }
  0x71   : > { %581 = vmatpush2.msra.mxu0 %v389_v10  ;;  %652 = vmatpush2.msra.mxu1 %v391_v11 }
  0x72   : > { %582 = vmatprep.subr.mxu0 %v382_v12  ;;  %653 = vmatprep.subr.mxu1 %v384_v13 }
  0x73   : > { %583 = vmatpush2.msra.mxu0 %v381_v14  ;;  %654 = vmatpush2.msra.mxu1 %v383_v15 }
  0x74   : > { %584 = vmatprep.subr.mxu0 %v374_v16  ;;  %655 = vmatprep.subr.mxu1 %v376_v17 }
  0x75   : > { %585 = vmatpush2.msra.mxu0 %v373_v18  ;;  %656 = vmatpush2.msra.mxu1 %v375_v19 }
  0x76   : > { %586 = vmatprep.subr.mxu0 %v366_v20  ;;  %657 = vmatprep.subr.mxu1 %v368_v21 }
  0x77   : > { %587 = vmatpush2.msra.mxu0 %v365_v22  ;;  %658 = vmatpush2.msra.mxu1 %v367_v23 }
  0x78   : > { %588 = vmatprep.subr.mxu0 %v358_v24  ;;  %659 = vmatprep.subr.mxu1 %v360_v25 }
  0x79   : > { %589 = vmatpush2.msra.mxu0 %v357_v26  ;;  %660 = vmatpush2.msra.mxu1 %v359_v27 }
  0x7a   : > { %590 = vmatprep.subr.mxu0 %v350_v28  ;;  %661 = vmatprep.subr.mxu1 %v352_v29 }
  0x7b   : > { %591 = vmatpush2.msra.mxu0 %v349_v30  ;;  %662 = vmatpush2.msra.mxu1 %v351_v31 }
  0x7c   : > { %592 = vmatprep.subr.mxu0 %v342_v32  ;;  %663 = vmatprep.subr.mxu1 %v344_v33 }
  0x7d   : > { %593 = vmatpush2.msra.mxu0 %v341_v34  ;;  %664 = vmatpush2.msra.mxu1 %v343_v35 }
  0x7e   : > { %594 = vmatprep.subr.mxu0 %v334_v36  ;;  %665 = vmatprep.subr.mxu1 %v336_v37 }
  0x7f   : > { %595 = vmatpush2.msra.mxu0 %v333_v38  ;;  %666 = vmatpush2.msra.mxu1 %v335_v39 }
  0x80   : > { %596 = vmatprep.subr.mxu0 %v326_v40  ;;  %667 = vmatprep.subr.mxu1 %v328_v41 }
  0x81   : > { %597 = vmatpush2.msra.mxu0 %v325_v42  ;;  %668 = vmatpush2.msra.mxu1 %v327_v43 }
  0x82   : > { %598 = vmatprep.subr.mxu0 %v318_v44  ;;  %669 = vmatprep.subr.mxu1 %v320_v45 }
  0x83   : > { %599 = vmatpush2.msra.mxu0 %v317_v46  ;;  %670 = vmatpush2.msra.mxu1 %v319_v47 }
  0x84   : > { %600 = vmatprep.subr.mxu0 %v310_v48  ;;  %671 = vmatprep.subr.mxu1 %v312_v49 }
  0x85   : > { %601 = vmatpush2.msra.mxu0 %v309_v50  ;;  %672 = vmatpush2.msra.mxu1 %v311_v51 }
  0x86   : > { %602 = vmatprep.subr.mxu0 %v302_v52  ;;  %673 = vmatprep.subr.mxu1 %v304_v53 }
  0x87   : > { %603 = vmatpush2.msra.mxu0 %v301_v54  ;;  %674 = vmatpush2.msra.mxu1 %v303_v55 }
  0x88   : > { %604 = vmatprep.subr.mxu0 %v294_v57  ;;  %675 = vmatprep.subr.mxu1 %v296_v58 }
  0x89   : > { %605 = vmatpush2.msra.mxu0 %v293_v59  ;;  %676 = vmatpush2.msra.mxu1 %v295_v60 }
  0x8a   : > { %606 = vmatprep.subr.mxu0 %v286_v61  ;;  %677 = vmatprep.subr.mxu1 %v288_v62 }
  0x8b   : > { %607 = vmatpush2.msra.mxu0 %v285_v0  ;;  %678 = vmatpush2.msra.mxu1 %v287_v1 }
  0x8c   : > { %608 = vmatprep.subr.mxu0 %v278_v2  ;;  %679 = vmatprep.subr.mxu1 %v280_v3 }
  0x8d   : > { %609 = vmatpush2.msra.mxu0 %v277_v4  ;;  %610 = vmatprep.mubr.f32.mxu0 %v1214_v63 }
  0x8e   : > { %680 = vmatpush2.msra.mxu1 %v279_v5  ;;  %681 = vmatprep.mubr.f32.mxu1 %v1214_v63 }
  0x8f   : > { %611 = vmatmul.mubr.f32.vlgmr.msra.gmra.mxu0 %v1192_v56  ;;  %682 = vmatmul.mubr.f32.vlgmr.msra.gmra.mxu1 %v1192_v56 }
 0x10d   : > { %v470_v6 = vpop.f32.mrf.mxu0  ;;  %v541_v7 = vpop.f32.mrf.mxu1 }
 0x10f   : > { %v472_v8 = vpop.f32.mrf.mxu0  ;;  %v543_v9 = vpop.f32.mrf.mxu1 }
 0x110   : > { %v696_v10 = vcombine.low %v470_v6, %v472_v8  ;;  %v697_v11 = vcombine.low %v541_v7, %v543_v9 }
 0x112   : > { %704 = vst [vmem:[%s143_s11] sm:$0xff] %v696_v10  ;;  %705 = vst [vmem:[%s143_s11 + $0x8] sm:$0xff] %v697_v11 }
 0x14f   : > { %v612_v12 = vpop.f32.mrf.mxu0  ;;  %v683_v13 = vpop.f32.mrf.mxu1 }
 0x151   : > { %v614_v63 = vpop.f32.mrf.mxu0  ;;  %v685_v14 = vpop.f32.mrf.mxu1 }
 0x152   : > { %v698_v15 = vcombine.low %v612_v12, %v614_v63  ;;  %v699_v16 = vcombine.low %v683_v13, %v685_v14 }
 0x154   : > { %706 = vst [vmem:[%s143_s11 + $0x10] sm:$0xff] %v698_v15  ;;  %707 = vst [vmem:[%s143_s11 + $0x18] sm:$0xff] %v699_v16 }
 0x155 PF: > { %s12_s9 = sadd.s32 1, %s791_s9  }
 0x156   : > { %p9_p4 = scmp.ge.s32.totalorder %s12_s9, 4  }
 0x158   :  { %11 = sbr.rel (!%p9_p4) target bundleno = 1 (0x1), region = 58 }

</bundles_post_ra>
